<compile_context>
chip_gen: v7x
topology: tpu7x:2x2x1
jax: 0.10.0
libtpu: 0.0.40
codegen_flags: <defaults>
</compile_context>

<pallas_src>
import functools
import math

import jax
import jax.numpy as jnp
from jax.experimental import pallas as pl
from jax.experimental.pallas import tpu as pltpu


def _round_up(v, m):
    return (v + m - 1) // m * m


# ----------------------------------------------------------------------------
# The single fused Pallas kernel (one grid step == one image)
# ----------------------------------------------------------------------------
def _bottleneck_kernel(x_ref, m_ref, w1_ref, b1_ref, w2_ref, b2_ref,
                       w3_ref, b3_ref, wd_ref, bd_ref, o_ref, taps_ref, *,
                       wp, qp, has_downsample):
    """Channels on sublanes, flattened padded pixels on lanes.

    x_ref   : [1, Cin_p, Pe]   zero-padded image, spatial flattened row-major
                               with padded width Wp, extra zero lanes to Pe.
    m_ref   : [1, Pe]          1.0 on interior pixels, 0.0 on the padding ring.
    w*_ref  : BN-folded weights (compute dtype), b*_ref: f32 column biases.
    o_ref   : [1, Cout_p, Qp]  stride-1 output on the padded-row pixel grid.
    taps_ref: [9*Cmid_p, Qp]   scratch: the 9 lane-shifted copies of h1.
    """
    cdt = w1_ref.dtype
    cmid_p = w1_ref.shape[0]

    x2d = x_ref[0]                                          # [Cin_p, Pe] f32

    # conv1 (1x1) + bn1 + relu, computed ONCE over every padded position.
    h1 = jnp.dot(w1_ref[...], x2d.astype(cdt),
                 preferred_element_type=jnp.float32) + b1_ref[...]
    # Mask kills conv2's zero-padding taps (relu(b1) != 0 on the pad ring).
    h1 = (jnp.maximum(h1, 0.0) * m_ref[...]).astype(cdt)    # [Cmid_p, Pe]

    # In-VMEM im2col of h1: tap (dh, dw) of output pixel q is lane
    # q + dh*Wp + dw, so the nine taps are just static lane shifts.
    for t in range(9):
        off = (t // 3) * wp + (t % 3)
        taps_ref[t * cmid_p:(t + 1) * cmid_p, :] = h1[:, off:off + qp]

    # conv2 (3x3) + bn2 + relu as ONE deep contraction over 9*Cmid_p.
    h2 = jnp.dot(w2_ref[...], taps_ref[...],
                 preferred_element_type=jnp.float32) + b2_ref[...]
    h2 = jnp.maximum(h2, 0.0).astype(cdt)                   # [Cmid_p, Qp]

    # conv3 (1x1) + bn3.
    h3 = jnp.dot(w3_ref[...], h2,
                 preferred_element_type=jnp.float32) + b3_ref[...]

    # Identity path: the centre tap (offset Wp+1) is x at the output pixel.
    x_c = x2d[:, wp + 1: wp + 1 + qp]                       # [Cin_p, Qp] f32
    if has_downsample:
        ident = jnp.dot(wd_ref[...], x_c.astype(cdt),
                        preferred_element_type=jnp.float32) + bd_ref[...]
    else:
        ident = x_c                                         # Cin_p == Cout_p

    o_ref[0] = jnp.maximum(h3 + ident, 0.0)


# ----------------------------------------------------------------------------
# Wrapper: BN folding, channel/lane padding, one pallas_call, NCHW un-flatten
# ----------------------------------------------------------------------------
def block_forward(x, params, stride=1, use_bf16=True):
    """x: [B, Cin, H, W] float32 (NCHW). Returns [B, 4*Cmid, Ho, Wo]."""
    B, Cin, H, W = x.shape
    Cmid = params["w1"].shape[0]
    Cout = 4 * Cmid
    has_downsample = (Cin != Cout) or (stride != 1)
    eps = 1e-5
    cdt = jnp.bfloat16 if use_bf16 else jnp.float32

    # ---- fold BatchNorm (eval / running stats) into conv weights + biases ---
    def fold(w, gamma, beta, mean, var, conv_bias=None):
        scale = gamma * jax.lax.rsqrt(var + eps)
        wf = w * scale.reshape((-1,) + (1,) * (w.ndim - 1))
        bias = jnp.zeros_like(mean) if conv_bias is None else conv_bias
        bf = scale * (bias - mean) + beta
        return wf.astype(jnp.float32), bf.astype(jnp.float32)

    w1f, b1f = fold(params["w1"], params["bn1_g"], params["bn1_b"],
                    params["bn1_m"], params["bn1_v"])              # [Cmid,Cin]
    w2f, b2f = fold(params["w2"], params["bn2_g"], params["bn2_b"],
                    params["bn2_m"], params["bn2_v"])              # [Cmid,Cmid,3,3]
    w3f, b3f = fold(params["w3"], params["bn3_g"], params["bn3_b"],
                    params["bn3_m"], params["bn3_v"])              # [Cout,Cmid]
    if has_downsample:
        wdf, bdf = fold(params["wd"], params["bnd_g"], params["bnd_b"],
                        params["bnd_m"], params["bnd_v"],
                        conv_bias=params["bd"])                    # [Cout,Cin]

    # ---- pad channel counts up to multiples of 8 (sublane alignment) --------
    Cin_p = _round_up(Cin, 8)
    Cmid_p = _round_up(Cmid, 8)
    Cout_p = _round_up(Cout, 8)

    def padw(w, r, c):
        return jnp.pad(w, ((0, r - w.shape[0]), (0, c - w.shape[1])))

    def padb(b, r):
        return jnp.pad(b, (0, r - b.shape[0])).reshape(r, 1)

    w1p = padw(w1f, Cmid_p, Cin_p).astype(cdt)
    b1p = padb(b1f, Cmid_p)
    # conv2 weight as one tap-stacked matrix [Cmid_p, 9*Cmid_p].
    w2t = jnp.transpose(w2f, (2, 3, 0, 1)).reshape(9, Cmid, Cmid)   # [t,co,ci]
    w2t = jnp.pad(w2t, ((0, 0), (0, Cmid_p - Cmid), (0, Cmid_p - Cmid)))
    w2s = jnp.transpose(w2t, (1, 0, 2)).reshape(Cmid_p, 9 * Cmid_p).astype(cdt)
    b2p = padb(b2f, Cmid_p)
    w3p = padw(w3f, Cout_p, Cmid_p).astype(cdt)
    b3p = padb(b3f, Cout_p)
    if has_downsample:
        wdp = padw(wdf, Cout_p, Cin_p).astype(cdt)
        bdp = padb(bdf, Cout_p)
    else:
        wdp = jnp.zeros((Cout_p, Cin_p), cdt)
        bdp = jnp.zeros((Cout_p, 1), jnp.float32)

    # ---- lane-dense geometry -------------------------------------------------
    Hp, Wp = H + 2, W + 2
    Q = H * Wp                               # stride-1 outputs (padded-row pitch)
    Qp = _round_up(Q, 128)                   # lane-dense output width
    Pe = _round_up(Qp + 2 * Wp + 2, 128)     # input lanes incl. the 3x3 halo

    # Padded + flattened input; channels already on sublanes (no transpose).
    xp = jnp.pad(x.astype(jnp.float32),
                 ((0, 0), (0, Cin_p - Cin), (1, 1), (1, 1)))   # [B,Cin_p,Hp,Wp]
    xp = xp.reshape(B, Cin_p, Hp * Wp)
    xp = jnp.pad(xp, ((0, 0), (0, 0), (0, Pe - Hp * Wp)))      # [B,Cin_p,Pe]

    # Interior-pixel mask (same for every image).
    pp = jnp.arange(Pe, dtype=jnp.int32)
    row, col = pp // Wp, pp % Wp
    mask = ((pp < Hp * Wp) & (row >= 1) & (row <= H)
            & (col >= 1) & (col <= W)).astype(jnp.float32)[None, :]   # [1,Pe]

    kernel = functools.partial(_bottleneck_kernel, wp=Wp, qp=Qp,
                               has_downsample=has_downsample)
    out = pl.pallas_call(
        kernel,
        out_shape=jax.ShapeDtypeStruct((B, Cout_p, Qp), jnp.float32),
        grid=(B,),
        in_specs=[
            pl.BlockSpec((1, Cin_p, Pe), lambda b: (b, 0, 0)),
            pl.BlockSpec((1, Pe), lambda b: (0, 0)),
            pl.BlockSpec((Cmid_p, Cin_p), lambda b: (0, 0)),
            pl.BlockSpec((Cmid_p, 1), lambda b: (0, 0)),
            pl.BlockSpec((Cmid_p, 9 * Cmid_p), lambda b: (0, 0)),
            pl.BlockSpec((Cmid_p, 1), lambda b: (0, 0)),
            pl.BlockSpec((Cout_p, Cmid_p), lambda b: (0, 0)),
            pl.BlockSpec((Cout_p, 1), lambda b: (0, 0)),
            pl.BlockSpec((Cout_p, Cin_p), lambda b: (0, 0)),
            pl.BlockSpec((Cout_p, 1), lambda b: (0, 0)),
        ],
        out_specs=pl.BlockSpec((1, Cout_p, Qp), lambda b: (b, 0, 0)),
        scratch_shapes=[pltpu.VMEM((9 * Cmid_p, Qp), cdt)],
        compiler_params=pltpu.CompilerParams(
            dimension_semantics=("parallel",),
            vmem_limit_bytes=48 * 1024 * 1024),
    )(xp, mask, w1p, b1p, w2s, b2p, w3p, b3p, wdp, bdp)

    # Strip channel/lane padding, un-flatten, apply conv2's stride.
    out = out[:, :Cout, :Q].reshape(B, Cout, H, Wp)[:, :, :, :W]
    if stride != 1:
        out = out[:, :, ::stride, ::stride]
    return out


# ----------------------------------------------------------------------------
# Pure-JAX reference (correctness check)
# ----------------------------------------------------------------------------
def _reference_forward(x, params, stride=1):
    eps = 1e-5
    hp = jax.lax.Precision.HIGHEST

    def bn(y, g, b, m, v):
        s = (g * jax.lax.rsqrt(v + eps)).reshape(1, -1, 1, 1)
        return (y - m.reshape(1, -1, 1, 1)) * s + b.reshape(1, -1, 1, 1)

    def conv(y, w, s=1, pad=0):
        return jax.lax.conv_general_dilated(
            y, w, window_strides=(s, s), padding=((pad, pad), (pad, pad)),
            dimension_numbers=("NCHW", "OIHW", "NCHW"), precision=hp)

    Cmid = params["w1"].shape[0]
    Cin = x.shape[1]
    Cout = 4 * Cmid
    has_downsample = (Cin != Cout) or (stride != 1)

    identity = x
    h = conv(x, params["w1"].reshape(Cmid, Cin, 1, 1))
    h = jax.nn.relu(bn(h, params["bn1_g"], params["bn1_b"],
                       params["bn1_m"], params["bn1_v"]))
    h = conv(h, params["w2"], s=stride, pad=1)
    h = jax.nn.relu(bn(h, params["bn2_g"], params["bn2_b"],
                       params["bn2_m"], params["bn2_v"]))
    h = conv(h, params["w3"].reshape(Cout, Cmid, 1, 1))
    h = bn(h, params["bn3_g"], params["bn3_b"],
           params["bn3_m"], params["bn3_v"])
    if has_downsample:
        identity = conv(x, params["wd"].reshape(Cout, Cin, 1, 1), s=stride)
        identity = identity + params["bd"].reshape(1, -1, 1, 1)
        identity = bn(identity, params["bnd_g"], params["bnd_b"],
                      params["bnd_m"], params["bnd_v"])
    return jax.nn.relu(h + identity)


# ----------------------------------------------------------------------------
# Deterministic parameter init
# ----------------------------------------------------------------------------
def init_params(key, cin, cmid):
    cout = 4 * cmid
    ks = jax.random.split(key, 10)

    def w(k, shape, fan_in):
        return jax.random.normal(k, shape, jnp.float32) / math.sqrt(fan_in)

    def bn_params(k, c):
        k1, k2, k3, k4 = jax.random.split(k, 4)
        return (jax.random.uniform(k1, (c,), jnp.float32, 0.5, 1.5),   # gamma
                jax.random.normal(k2, (c,), jnp.float32) * 0.1,        # beta
                jax.random.normal(k3, (c,), jnp.float32) * 0.1,        # run mean
                jax.random.uniform(k4, (c,), jnp.float32, 0.5, 1.5))   # run var

    p = dict(
        w1=w(ks[0], (cmid, cin), cin),
        w2=w(ks[1], (cmid, cmid, 3, 3), cmid * 9),
        w3=w(ks[2], (cout, cmid), cmid),
        wd=w(ks[3], (cout, cin), cin),
        bd=jax.random.normal(ks[4], (cout,), jnp.float32) * 0.1,
    )
    p["bn1_g"], p["bn1_b"], p["bn1_m"], p["bn1_v"] = bn_params(ks[5], cmid)
    p["bn2_g"], p["bn2_b"], p["bn2_m"], p["bn2_v"] = bn_params(ks[6], cmid)
    p["bn3_g"], p["bn3_b"], p["bn3_m"], p["bn3_v"] = bn_params(ks[7], cout)
    p["bnd_g"], p["bnd_b"], p["bnd_m"], p["bnd_v"] = bn_params(ks[8], cout)
    return p


if __name__ == "__main__":
    key = jax.random.PRNGKey(0)
    kx, kp = jax.random.split(key)
    B, Cin, H, W = 2, 4, 16, 16
    Cmid = 4                       # intermediate_channels; Cout = 4*Cmid = 16
    stride = 1

    x = jax.random.normal(kx, (B, Cin, H, W), jnp.float32)
    params = init_params(kp, Cin, Cmid)
    ref = _reference_forward(x, params, stride=stride)
    ref_scale = float(jnp.max(jnp.abs(ref))) + 1e-6

    # 1) all-f32 kernel: validates the fused algorithm / BN fold / in-VMEM
    #    im2col tightly (typically ~1e-6 relative; 1e-3 leaves MXU margin).
    fwd_f32 = jax.jit(functools.partial(block_forward, stride=stride,
                                        use_bf16=False))
    out_f32 = jax.block_until_ready(fwd_f32(x, params))
    err_f32 = float(jnp.max(jnp.abs(out_f32 - ref))) / ref_scale
    assert err_f32 < 1e-3, f"f32 kernel mismatch vs reference: {err_f32}"

    # 2) fast path: bf16 MXU operands, f32 accumulation.
    fwd = jax.jit(functools.partial(block_forward, stride=stride,
                                    use_bf16=True))
    out = jax.block_until_ready(fwd(x, params))
    err_bf16 = float(jnp.max(jnp.abs(out - ref))) / ref_scale
    assert out.shape == (B, 4 * Cmid, H, W)
    assert bool(jnp.all(jnp.isfinite(out)))
    assert err_bf16 < 2e-2, f"bf16 kernel mismatch vs reference: {err_bf16}"

    print("KERNEL_OK")
</pallas_src>

<mosaic_0001>
module attributes {stable_mosaic.version = 11 : i64} {
  func.func @_bottleneck_kernel(%arg0: i32, %arg1: memref<1x8x512xf32, #tpu.memory_space<vmem>>, %arg2: memref<1x512xf32, #tpu.memory_space<vmem>>, %arg3: memref<8x8xf32, #tpu.memory_space<vmem>>, %arg4: memref<8x1xf32, #tpu.memory_space<vmem>>, %arg5: memref<8x72xf32, #tpu.memory_space<vmem>>, %arg6: memref<8x1xf32, #tpu.memory_space<vmem>>, %arg7: memref<16x8xf32, #tpu.memory_space<vmem>>, %arg8: memref<16x1xf32, #tpu.memory_space<vmem>>, %arg9: memref<16x8xf32, #tpu.memory_space<vmem>>, %arg10: memref<16x1xf32, #tpu.memory_space<vmem>>, %arg11: memref<1x16x384xf32, #tpu.memory_space<vmem>>, %arg12: memref<72x384xf32, #tpu.memory_space<vmem>>) attributes {dimension_semantics = [#tpu.dimension_semantics<parallel>], iteration_bounds = array<i64: 2>, scalar_prefetch = 0 : i64, scratch_operands = 1 : i64, tpu.core_type = #tpu.core_type<tc>, window_params = [{transform_indices = @transform_0, window_bounds = array<i64: 1, 8, 512>}, {pipeline_mode = #tpu.pipeline_mode<synchronous>, transform_indices = @transform_1, window_bounds = array<i64: 1, 512>}, {pipeline_mode = #tpu.pipeline_mode<synchronous>, transform_indices = @transform_2, window_bounds = array<i64: 8, 8>}, {pipeline_mode = #tpu.pipeline_mode<synchronous>, transform_indices = @transform_3, window_bounds = array<i64: 8, 1>}, {pipeline_mode = #tpu.pipeline_mode<synchronous>, transform_indices = @transform_4, window_bounds = array<i64: 8, 72>}, {pipeline_mode = #tpu.pipeline_mode<synchronous>, transform_indices = @transform_5, window_bounds = array<i64: 8, 1>}, {pipeline_mode = #tpu.pipeline_mode<synchronous>, transform_indices = @transform_6, window_bounds = array<i64: 16, 8>}, {pipeline_mode = #tpu.pipeline_mode<synchronous>, transform_indices = @transform_7, window_bounds = array<i64: 16, 1>}, {pipeline_mode = #tpu.pipeline_mode<synchronous>, transform_indices = @transform_8, window_bounds = array<i64: 16, 8>}, {pipeline_mode = #tpu.pipeline_mode<synchronous>, transform_indices = @transform_9, window_bounds = array<i64: 16, 1>}, {transform_indices = @transform_10, window_bounds = array<i64: 1, 16, 384>}]} {
    %c0 = arith.constant 0 : index
    %c0_0 = arith.constant 0 : index
    %c0_1 = arith.constant 0 : index
    %0 = vector.load %arg1[%c0, %c0_0, %c0_1] : memref<1x8x512xf32, #tpu.memory_space<vmem>>, vector<1x8x512xf32>
    %1 = vector.shape_cast %0 : vector<1x8x512xf32> to vector<8x512xf32>
    %c0_2 = arith.constant 0 : index
    %c0_3 = arith.constant 0 : index
    %2 = vector.load %arg3[%c0_2, %c0_3] : memref<8x8xf32, #tpu.memory_space<vmem>>, vector<8x8xf32>
    %cst = arith.constant dense<0.000000e+00> : vector<8x512xf32>
    %3 = tpu.matmul %2, %1, %cst {dimension_numbers = #tpu.dot_dimension_numbers<[1], [0], [0], [1], [0, 0, 1, 1], [], []>} : vector<8x8xf32>, vector<8x512xf32>, vector<8x512xf32> -> vector<8x512xf32>
    %c0_4 = arith.constant 0 : index
    %c0_5 = arith.constant 0 : index
    %4 = vector.load %arg4[%c0_4, %c0_5] : memref<8x1xf32, #tpu.memory_space<vmem>>, vector<8x1xf32>
    %5 = vector.broadcast %4 : vector<8x1xf32> to vector<8x512xf32>
    %6 = arith.addf %3, %5 : vector<8x512xf32>
    %cst_6 = arith.constant 0.000000e+00 : f32
    %7 = vector.broadcast %cst_6 : f32 to vector<8x512xf32>
    %8 = arith.maximumf %6, %7 : vector<8x512xf32>
    %c0_7 = arith.constant 0 : index
    %c0_8 = arith.constant 0 : index
    %9 = vector.load %arg2[%c0_7, %c0_8] : memref<1x512xf32, #tpu.memory_space<vmem>>, vector<1x512xf32>
    %10 = vector.broadcast %9 : vector<1x512xf32> to vector<8x512xf32>
    %11 = arith.mulf %8, %10 : vector<8x512xf32>
    %12 = vector.extract_strided_slice %11 {offsets = [0, 0], sizes = [8, 384], strides = [1, 1]} : vector<8x512xf32> to vector<8x384xf32>
    %c0_9 = arith.constant 0 : index
    %c0_10 = arith.constant 0 : index
    %13 = vector.load %arg12[%c0_9, %c0_10] : memref<72x384xf32, #tpu.memory_space<vmem>>, vector<8x384xf32>
    tpu.vector_store %arg12[%c0_9, %c0_10], %12 {strides = array<i32>} : memref<72x384xf32, #tpu.memory_space<vmem>>, vector<8x384xf32>,
    %14 = vector.extract_strided_slice %11 {offsets = [0, 1], sizes = [8, 384], strides = [1, 1]} : vector<8x512xf32> to vector<8x384xf32>
    %c8 = arith.constant 8 : index
    %c0_11 = arith.constant 0 : index
    %15 = vector.load %arg12[%c8, %c0_11] : memref<72x384xf32, #tpu.memory_space<vmem>>, vector<8x384xf32>
    tpu.vector_store %arg12[%c8, %c0_11], %14 {strides = array<i32>} : memref<72x384xf32, #tpu.memory_space<vmem>>, vector<8x384xf32>,
    %16 = vector.extract_strided_slice %11 {offsets = [0, 2], sizes = [8, 384], strides = [1, 1]} : vector<8x512xf32> to vector<8x384xf32>
    %c16 = arith.constant 16 : index
    %c0_12 = arith.constant 0 : index
    %17 = vector.load %arg12[%c16, %c0_12] : memref<72x384xf32, #tpu.memory_space<vmem>>, vector<8x384xf32>
    tpu.vector_store %arg12[%c16, %c0_12], %16 {strides = array<i32>} : memref<72x384xf32, #tpu.memory_space<vmem>>, vector<8x384xf32>,
    %18 = vector.extract_strided_slice %11 {offsets = [0, 18], sizes = [8, 384], strides = [1, 1]} : vector<8x512xf32> to vector<8x384xf32>
    %c24 = arith.constant 24 : index
    %c0_13 = arith.constant 0 : index
    %19 = vector.load %arg12[%c24, %c0_13] : memref<72x384xf32, #tpu.memory_space<vmem>>, vector<8x384xf32>
    tpu.vector_store %arg12[%c24, %c0_13], %18 {strides = array<i32>} : memref<72x384xf32, #tpu.memory_space<vmem>>, vector<8x384xf32>,
    %20 = vector.extract_strided_slice %11 {offsets = [0, 19], sizes = [8, 384], strides = [1, 1]} : vector<8x512xf32> to vector<8x384xf32>
    %c32 = arith.constant 32 : index
    %c0_14 = arith.constant 0 : index
    %21 = vector.load %arg12[%c32, %c0_14] : memref<72x384xf32, #tpu.memory_space<vmem>>, vector<8x384xf32>
    tpu.vector_store %arg12[%c32, %c0_14], %20 {strides = array<i32>} : memref<72x384xf32, #tpu.memory_space<vmem>>, vector<8x384xf32>,
    %22 = vector.extract_strided_slice %11 {offsets = [0, 20], sizes = [8, 384], strides = [1, 1]} : vector<8x512xf32> to vector<8x384xf32>
    %c40 = arith.constant 40 : index
    %c0_15 = arith.constant 0 : index
    %23 = vector.load %arg12[%c40, %c0_15] : memref<72x384xf32, #tpu.memory_space<vmem>>, vector<8x384xf32>
    tpu.vector_store %arg12[%c40, %c0_15], %22 {strides = array<i32>} : memref<72x384xf32, #tpu.memory_space<vmem>>, vector<8x384xf32>,
    %24 = vector.extract_strided_slice %11 {offsets = [0, 36], sizes = [8, 384], strides = [1, 1]} : vector<8x512xf32> to vector<8x384xf32>
    %c48 = arith.constant 48 : index
    %c0_16 = arith.constant 0 : index
    %25 = vector.load %arg12[%c48, %c0_16] : memref<72x384xf32, #tpu.memory_space<vmem>>, vector<8x384xf32>
    tpu.vector_store %arg12[%c48, %c0_16], %24 {strides = array<i32>} : memref<72x384xf32, #tpu.memory_space<vmem>>, vector<8x384xf32>,
    %26 = vector.extract_strided_slice %11 {offsets = [0, 37], sizes = [8, 384], strides = [1, 1]} : vector<8x512xf32> to vector<8x384xf32>
    %c56 = arith.constant 56 : index
    %c0_17 = arith.constant 0 : index
    %27 = vector.load %arg12[%c56, %c0_17] : memref<72x384xf32, #tpu.memory_space<vmem>>, vector<8x384xf32>
    tpu.vector_store %arg12[%c56, %c0_17], %26 {strides = array<i32>} : memref<72x384xf32, #tpu.memory_space<vmem>>, vector<8x384xf32>,
    %28 = vector.extract_strided_slice %11 {offsets = [0, 38], sizes = [8, 384], strides = [1, 1]} : vector<8x512xf32> to vector<8x384xf32>
    %c64 = arith.constant 64 : index
    %c0_18 = arith.constant 0 : index
    %29 = vector.load %arg12[%c64, %c0_18] : memref<72x384xf32, #tpu.memory_space<vmem>>, vector<8x384xf32>
    tpu.vector_store %arg12[%c64, %c0_18], %28 {strides = array<i32>} : memref<72x384xf32, #tpu.memory_space<vmem>>, vector<8x384xf32>,
    %c0_19 = arith.constant 0 : index
    %c0_20 = arith.constant 0 : index
    %30 = vector.load %arg5[%c0_19, %c0_20] : memref<8x72xf32, #tpu.memory_space<vmem>>, vector<8x72xf32>
    %c0_21 = arith.constant 0 : index
    %c0_22 = arith.constant 0 : index
    %31 = vector.load %arg12[%c0_21, %c0_22] : memref<72x384xf32, #tpu.memory_space<vmem>>, vector<72x384xf32>
    %cst_23 = arith.constant dense<0.000000e+00> : vector<8x384xf32>
    %32 = tpu.matmul %30, %31, %cst_23 {dimension_numbers = #tpu.dot_dimension_numbers<[1], [0], [0], [1], [0, 0, 1, 1], [], []>} : vector<8x72xf32>, vector<72x384xf32>, vector<8x384xf32> -> vector<8x384xf32>
    %c0_24 = arith.constant 0 : index
    %c0_25 = arith.constant 0 : index
    %33 = vector.load %arg6[%c0_24, %c0_25] : memref<8x1xf32, #tpu.memory_space<vmem>>, vector<8x1xf32>
    %34 = vector.broadcast %33 : vector<8x1xf32> to vector<8x384xf32>
    %35 = arith.addf %32, %34 : vector<8x384xf32>
    %cst_26 = arith.constant 0.000000e+00 : f32
    %36 = vector.broadcast %cst_26 : f32 to vector<8x384xf32>
    %37 = arith.maximumf %35, %36 : vector<8x384xf32>
    %c0_27 = arith.constant 0 : index
    %c0_28 = arith.constant 0 : index
    %38 = vector.load %arg7[%c0_27, %c0_28] : memref<16x8xf32, #tpu.memory_space<vmem>>, vector<16x8xf32>
    %cst_29 = arith.constant dense<0.000000e+00> : vector<16x384xf32>
    %39 = tpu.matmul %38, %37, %cst_29 {dimension_numbers = #tpu.dot_dimension_numbers<[1], [0], [0], [1], [0, 0, 1, 1], [], []>} : vector<16x8xf32>, vector<8x384xf32>, vector<16x384xf32> -> vector<16x384xf32>
    %c0_30 = arith.constant 0 : index
    %c0_31 = arith.constant 0 : index
    %40 = vector.load %arg8[%c0_30, %c0_31] : memref<16x1xf32, #tpu.memory_space<vmem>>, vector<16x1xf32>
    %41 = vector.broadcast %40 : vector<16x1xf32> to vector<16x384xf32>
    %42 = arith.addf %39, %41 : vector<16x384xf32>
    %43 = vector.extract_strided_slice %1 {offsets = [0, 19], sizes = [8, 384], strides = [1, 1]} : vector<8x512xf32> to vector<8x384xf32>
    %c0_32 = arith.constant 0 : index
    %c0_33 = arith.constant 0 : index
    %44 = vector.load %arg9[%c0_32, %c0_33] : memref<16x8xf32, #tpu.memory_space<vmem>>, vector<16x8xf32>
    %cst_34 = arith.constant dense<0.000000e+00> : vector<16x384xf32>
    %45 = tpu.matmul %44, %43, %cst_34 {dimension_numbers = #tpu.dot_dimension_numbers<[1], [0], [0], [1], [0, 0, 1, 1], [], []>} : vector<16x8xf32>, vector<8x384xf32>, vector<16x384xf32> -> vector<16x384xf32>
    %c0_35 = arith.constant 0 : index
    %c0_36 = arith.constant 0 : index
    %46 = vector.load %arg10[%c0_35, %c0_36] : memref<16x1xf32, #tpu.memory_space<vmem>>, vector<16x1xf32>
    %47 = vector.broadcast %46 : vector<16x1xf32> to vector<16x384xf32>
    %48 = arith.addf %45, %47 : vector<16x384xf32>
    %49 = arith.addf %42, %48 : vector<16x384xf32>
    %cst_37 = arith.constant 0.000000e+00 : f32
    %50 = vector.broadcast %cst_37 : f32 to vector<16x384xf32>
    %51 = arith.maximumf %49, %50 : vector<16x384xf32>
    %c0_38 = arith.constant 0 : index
    %c0_39 = arith.constant 0 : index
    %c0_40 = arith.constant 0 : index
    %52 = vector.load %arg11[%c0_38, %c0_39, %c0_40] : memref<1x16x384xf32, #tpu.memory_space<vmem>>, vector<1x16x384xf32>
    %53 = vector.shape_cast %52 : vector<1x16x384xf32> to vector<16x384xf32>
    %54 = vector.shape_cast %51 : vector<16x384xf32> to vector<1x16x384xf32>
    tpu.vector_store %arg11[%c0_38, %c0_39, %c0_40], %54 {strides = array<i32>} : memref<1x16x384xf32, #tpu.memory_space<vmem>>, vector<1x16x384xf32>,
    return
  }
  func.func @transform_0(%arg0: i32) -> (i32, i32, i32) {
    %c0_i32 = arith.constant 0 : i32
    %c0_i32_0 = arith.constant 0 : i32
    %c0_i32_1 = arith.constant 0 : i32
    return %arg0, %c0_i32, %c0_i32_0 : i32, i32, i32
  }
  func.func @transform_1(%arg0: i32) -> (i32, i32) {
    %c0_i32 = arith.constant 0 : i32
    %c0_i32_0 = arith.constant 0 : i32
    %c0_i32_1 = arith.constant 0 : i32
    return %c0_i32, %c0_i32_0 : i32, i32
  }
  func.func @transform_2(%arg0: i32) -> (i32, i32) {
    %c0_i32 = arith.constant 0 : i32
    %c0_i32_0 = arith.constant 0 : i32
    %c0_i32_1 = arith.constant 0 : i32
    return %c0_i32, %c0_i32_0 : i32, i32
  }
  func.func @transform_3(%arg0: i32) -> (i32, i32) {
    %c0_i32 = arith.constant 0 : i32
    %c0_i32_0 = arith.constant 0 : i32
    %c0_i32_1 = arith.constant 0 : i32
    return %c0_i32, %c0_i32_0 : i32, i32
  }
  func.func @transform_4(%arg0: i32) -> (i32, i32) {
    %c0_i32 = arith.constant 0 : i32
    %c0_i32_0 = arith.constant 0 : i32
    %c0_i32_1 = arith.constant 0 : i32
    return %c0_i32, %c0_i32_0 : i32, i32
  }
  func.func @transform_5(%arg0: i32) -> (i32, i32) {
    %c0_i32 = arith.constant 0 : i32
    %c0_i32_0 = arith.constant 0 : i32
    %c0_i32_1 = arith.constant 0 : i32
    return %c0_i32, %c0_i32_0 : i32, i32
  }
  func.func @transform_6(%arg0: i32) -> (i32, i32) {
    %c0_i32 = arith.constant 0 : i32
    %c0_i32_0 = arith.constant 0 : i32
    %c0_i32_1 = arith.constant 0 : i32
    return %c0_i32, %c0_i32_0 : i32, i32
  }
  func.func @transform_7(%arg0: i32) -> (i32, i32) {
    %c0_i32 = arith.constant 0 : i32
    %c0_i32_0 = arith.constant 0 : i32
    %c0_i32_1 = arith.constant 0 : i32
    return %c0_i32, %c0_i32_0 : i32, i32
  }
  func.func @transform_8(%arg0: i32) -> (i32, i32) {
    %c0_i32 = arith.constant 0 : i32
    %c0_i32_0 = arith.constant 0 : i32
    %c0_i32_1 = arith.constant 0 : i32
    return %c0_i32, %c0_i32_0 : i32, i32
  }
  func.func @transform_9(%arg0: i32) -> (i32, i32) {
    %c0_i32 = arith.constant 0 : i32
    %c0_i32_0 = arith.constant 0 : i32
    %c0_i32_1 = arith.constant 0 : i32
    return %c0_i32, %c0_i32_0 : i32, i32
  }
  func.func @transform_10(%arg0: i32) -> (i32, i32, i32) {
    %c0_i32 = arith.constant 0 : i32
    %c0_i32_0 = arith.constant 0 : i32
    %c0_i32_1 = arith.constant 0 : i32
    return %arg0, %c0_i32, %c0_i32_0 : i32, i32, i32
  }
}

</mosaic_0001>

<bundles_post_ra>
// kernel: block_forward.1
= control target key start
LH: loop header
LB: loop body
LE: loop exit
PB: predicated region body
PF: predicated region fallthrough
CT: control target
= control target key end

     0   :  { %s1601_s13 = smov 0   ;;  %s1739_s0 = inlined_call_operand.vmem [shape: f32[2,8,512], index: 0, kind: input, shape index: {}]   ;;  %s1740_s1 = inlined_call_operand.vmem [shape: f32[1,512], index: 1, kind: input, shape index: {}]   ;;  %s1741_s2 = inlined_call_operand.vmem [shape: f32[8,8], index: 2, kind: input, shape index: {}]   ;;  %s1742_s3 = inlined_call_operand.vmem [shape: f32[8,1], index: 3, kind: input, shape index: {}]   ;;  %s1743_s4 = inlined_call_operand.vmem [shape: f32[8,72], index: 4, kind: input, shape index: {}]   ;;  %s1744_s5 = inlined_call_operand.vmem [shape: f32[8,1], index: 5, kind: input, shape index: {}]   ;;  %s1745_s6 = inlined_call_operand.vmem [shape: f32[16,8], index: 6, kind: input, shape index: {}]   ;;  %s1746_s7 = inlined_call_operand.vmem [shape: f32[16,1], index: 7, kind: input, shape index: {}]   ;;  %s1747_s8 = inlined_call_operand.vmem [shape: f32[16,8], index: 8, kind: input, shape index: {}]   ;;  %s1748_s9 = inlined_call_operand.vmem [shape: f32[16,1], index: 9, kind: input, shape index: {}]   ;;  %s1749_s10 = inlined_call_operand.vmem [shape: f32[2,16,384], index: 10, kind: output, shape index: {}]  }
   0x1 LB: > { %s1315_s14 = sadd.s32 4294967295, %s1532_s13   ;;  %p1319_p0 = scmp.ge.s32.totalorder %s1532_s13, 1  ;;  %s1532_s13 = sphi %s1601_s13, %s20_s13  }
   0x2   : > { %p312_p1 = scmp.lt.s32.totalorder %s1532_s13, 3 }
   0x4   : > { %p313_p2 = pnand %p1319_p0, %p312_p1 }
   0x5   : > { %p350_p3 = scmp.lt.s32.totalorder (!%p313_p2), %s1315_s14, 1  ;;  %v365_v0 = vld [vmem:[%s1742_s3] sm:$0xff] (!%p313_p2)  ;;  %v1534_v1 = vmov (!%p313_p2), 0.0   ;;  %v1535_v2 = vmov (!%p313_p2), 0   ;;  %vm371_vm0 = vcmask (!%p313_p2), 64512   ;;  %v523_v8 = vlaneseq (!%p313_p2)  ;;  %s1537_s25 = smov (!%p313_p2), 127  }
   0x6   : > { %316 = sbr.rel (%p313_p2) target bundleno = 838 (0x346), region = 60  ;;  %439 = vmatprep.mubr.f32.mxu0 (!%p313_p2), %v1534_v1  ;;  %510 = vmatprep.mubr.f32.mxu1 (!%p313_p2), %v1534_v1  ;;  %v364_v3 = vld [vmem:[%s1741_s2] sm:$0xff] (!%p313_p2)  ;;  %v1536_v28 = vmov (!%p313_p2), 0.0|0.0   ;;  %s1538_s26 = smov (!%p313_p2), 110   ;;  %vm1544_vm1 = vmmov (!%p313_p2), 0   ;;  %v883_v40 = vld [vmem:[%s1746_s7 + $0x8] sm:$0xff] (!%p313_p2) }
   0x7   : > { %1454 = vset.pattern.permute.xlu0 (!%p313_p2), %v1535_v2  ;;  %1525 = vset.pattern.permute.xlu1 (!%p313_p2), %v1535_v2  ;;  %v524_v9 = vshrl.u32 (!%p313_p2), %v523_v8, 7  ;;  %v521_v11 = vld [vmem:[%s1740_s1] sm:$0xf] (!%p313_p2)  ;;  %s1539_s27 = smov (!%p313_p2), 126   ;;  %s1540_s28 = smov (!%p313_p2), 108   ;;  %v1055_v43 = vld [vmem:[%s1748_s9 + $0x8] sm:$0xff] (!%p313_p2) }
   0x8   : > { %368 = vperm.xlu0 (!%p313_p2), %1454, %v365_v0   ;;  %s1541_s29 = smov (!%p313_p2), 109   ;;  %s1542_s30 = smov (!%p313_p2), 91   ;;  %v726_v39 = vld [vmem:[%s1744_s5] sm:$0xff] (!%p313_p2)  ;;  %vm562_vm2 = vcmask (!%p313_p2), 1039360   ;;  %vm598_vm3 = vcmask (!%p313_p2), 900096   ;;  %vm580_vm4 = vcmask (!%p313_p2), 1031168  }
   0x9   : > { %v525_v10 = vsub.s32 (!%p313_p2), 0, %v524_v9  ;;  %v533_v12 = vsub.s32 (!%p313_p2), 2, %v524_v9  ;;  %v529_v14 = vsub.s32 (!%p313_p2), 1, %v524_v9  ;;  %v537_v15 = vsub.s32 (!%p313_p2), 3, %v524_v9  ;;  %s1543_s11 = smov (!%p313_p2), 92   ;;  %s1545_s12 = smov (!%p313_p2), 90  }
   0xa   : > { %v1054_v41 = vld [vmem:[%s1748_s9] sm:$0xff] (!%p313_p2)  ;;  %vm634_vm5 = vcmask (!%p313_p2), 883712   ;;  %vm616_vm6 = vcmask (!%p313_p2), 891904   ;;  %vm670_vm7 = vcmask (!%p313_p2), 744448   ;;  %vm652_vm8 = vcmask (!%p313_p2), 752640  }
   0xb   : > { %v526_v17 = vrot.slane (!%p313_p2), %v521_v11, %v525_v10  ;;  %v534_v21 = vrot.slane (!%p313_p2), %v521_v11, %v533_v12  ;;  %v530_v25 = vrot.slane (!%p313_p2), %v521_v11, %v529_v14  ;;  %v538_v27 = vrot.slane (!%p313_p2), %v521_v11, %v537_v15  ;;  %v882_v42 = vld [vmem:[%s1746_s7] sm:$0xff] (!%p313_p2) }
   0xc   : > { %vm688_vm9 = vcmask (!%p313_p2), 736256   ;;  %vm732_vm10 = vcmask (!%p313_p2), 588800  }
   0xd   : > { %s1751_s14 = smov (!%p350_p3, %s1315_s14), 1 }
   0xe   : > { %s1337_s17 = sshll.u32 %s1751_s14, 5 }
   0xf   : > { %s354_s20 = scalar_lea.vmem %s1739_s0, %s1337_s17  ;;  %s1433_s17 = smul.u32 48, %s1751_s14 }
  0x10   : > { %v1623_v4 = vld [vmem:[%s354_s20 + $0x8] sm:$0xff]  ;;  %v1625_v5 = vld [vmem:[%s354_s20 + $0x18] sm:$0xff]  ;;  %v1627_v6 = vld [vmem:[%s354_s20] sm:$0xff] }
  0x11   : > { %375 = vmatprep.subr.mxu0 %v1623_v4  ;;  %446 = vmatprep.subr.mxu1 %v1625_v5  ;;  %v1631_v7 = vld [vmem:[%s354_s20 + $0x10] sm:$0xff]  ;;  %s359_s20 = scalar_lea.vmem %s1749_s10, %s1433_s17 }
  0x12   : > { %376 = vmatpush1.msra.mxu0 %v1627_v6  ;;  %447 = vmatpush1.msra.mxu1 %v1631_v7 }
  0x13   : > { %1323 = vmatmul.mubr.msk.f32.vlgmr.msra.gmra.mrb[0].mxu0 %vm371_vm0, %v364_v3  ;;  %1324 = vmatmul.mubr.msk.f32.vlgmr.msra.gmra.mrb[0].mxu1 %vm371_vm0, %v364_v3 }
  0x14   : > { %800 = vmatprep.mubr.f32.mxu0 %v1534_v1  ;;  %1401 = vmatprep.subr.bf16.mxu1 %v1536_v28 }
  0x15   : > { %1372 = vmatprep.mubr.msk.f32.mxu1 %vm1544_vm1, %v1534_v1 }
  0x87   : > { %v369_v13 = vpop.permute.xlu0 %368 }
  0xe6   : > { %v441_v16 = vpop.f32.mrb[0].mxu0  ;;  %v512_v18 = vpop.f32.mrb[0].mxu1 }
  0xe7   : > { %v442_v19 = vadd.f32 %v441_v16, %v369_v13  ;;  %v513_v20 = vadd.f32 %v512_v18, %v369_v13  ;;  %v443_v22 = vpop.f32.mrb[1].mxu0  ;;  %v514_v23 = vpop.f32.mrb[1].mxu1 }
  0xe8   : > { %v444_v24 = vadd.f32 %v443_v22, %v369_v13  ;;  %v515_v26 = vadd.f32 %v514_v23, %v369_v13 }
  0xe9   : > { %v517_v29 = vmax.f32 %v442_v19, 0.0  ;;  %v519_v30 = vmax.f32 %v513_v20, 0.0 }
  0xea   : > { %v518_v31 = vmax.f32 %v444_v24, 0.0  ;;  %v520_v32 = vmax.f32 %v515_v26, 0.0 }
  0xeb   : > { %v1642_v33 = vmul.f32 %v526_v17, %v517_v29  ;;  %v1644_v34 = vmul.f32 %v534_v21, %v519_v30 }
  0xec   : > { %v1646_v35 = vmul.f32 %v530_v25, %v518_v31  ;;  %v546_v36 = vmul.f32 %v538_v27, %v520_v32 }
  0xee   : > { %v1455_v37 = vpack.i.bf16 %v1644_v34, %v1646_v35  ;;  %v1460_v38 = vpack.i.bf16 %v546_v36, %v1642_v33 }
  0xf0   : > { %1456 = vrot.lane.b32.xlu0 %v1455_v37, %s1537_s25  ;;  %1461 = vrot.lane.b32.xlu1 %v1460_v38, %s1537_s25 }
  0xf4   : > { %1471 = vrot.lane.b32.xlu0 %v1455_v37, %s1538_s26  ;;  %1466 = vrot.lane.b32.xlu1 %v1455_v37, %s1539_s27 }
  0xf8   : > { %1481 = vrot.lane.b32.xlu0 %v1460_v38, %s1538_s26  ;;  %1476 = vrot.lane.b32.xlu1 %v1460_v38, %s1539_s27 }
  0xfc   : > { %1491 = vrot.lane.b32.xlu0 %v1455_v37, %s1540_s28  ;;  %1486 = vrot.lane.b32.xlu1 %v1455_v37, %s1541_s29 }
 0x100   : > { %1501 = vrot.lane.b32.xlu0 %v1460_v38, %s1540_s28  ;;  %1496 = vrot.lane.b32.xlu1 %v1460_v38, %s1541_s29 }
 0x104   : > { %1511 = vrot.lane.b32.xlu0 %v1455_v37, %s1542_s30  ;;  %1506 = vrot.lane.b32.xlu1 %v1455_v37, %s1543_s11 }
 0x108   : > { %1521 = vrot.lane.b32.xlu0 %v1460_v38, %s1542_s30  ;;  %1516 = vrot.lane.b32.xlu1 %v1460_v38, %s1543_s11 }
 0x10c   : > { %684 = vrot.lane.b32.xlu0 %v1644_v34, %s1545_s12  ;;  %682 = vrot.lane.b32.xlu1 %v1646_v35, %s1545_s12 }
 0x110   : > { %686 = vrot.lane.b32.xlu0 %v546_v36, %s1545_s12  ;;  %680 = vrot.lane.b32.xlu1 %v1642_v33, %s1545_s12 }
 0x114   : > { %1072 = vrot.lane.b32.xlu0 %v1623_v4, %s1541_s29  ;;  %729 = vperm.xlu1 %1525, %v726_v39  }
 0x118   : > { %1070 = vrot.lane.b32.xlu0 %v1627_v6, %s1541_s29  ;;  %1074 = vrot.lane.b32.xlu1 %v1631_v7, %s1541_s29 }
 0x11c   : > { %891 = vperm.xlu0 %1454, %v883_v40   ;;  %1076 = vrot.lane.b32.xlu1 %v1625_v5, %s1541_s29 }
 0x120   : > { %1058 = vperm.xlu0 %1454, %v1054_v41   ;;  %886 = vperm.xlu1 %1525, %v882_v42  }
 0x124   : > { %1063 = vperm.xlu1 %1525, %v1055_v43  }
 0x162   : > { %v1457_v44 = vpop.permute.xlu0 %1456  ;;  %v1462_v45 = vpop.permute.xlu1 %1461 }
 0x163   : > { %v1459_v46 = vunpack.i.h.bf16 %v1457_v44  ;;  %v1458_v47 = vunpack.i.l.bf16 %v1457_v44  ;;  %v1464_v48 = vunpack.i.h.bf16 %v1462_v45  ;;  %v1463_v49 = vunpack.i.l.bf16 %v1462_v45 }
 0x165   : > { %v565_v50 = vsel %vm562_vm2, %v1459_v46, %v1464_v48  ;;  %v563_v51 = vsel %vm562_vm2, %v1463_v49, %v1458_v47  ;;  %v564_v52 = vsel %vm562_vm2, %v1458_v47, %v1459_v46 }
 0x166   : > { %v1402_v53 = vpack.c.bf16 %v565_v50, %v1644_v34  ;;  %v1387_v54 = vpack.c.bf16 %v563_v51, %v1642_v33  ;;  %v1472_v55 = vpop.permute.xlu0 %1471  ;;  %v1467_v56 = vpop.permute.xlu1 %1466  ;;  %v1385_v57 = vpack.c.bf16 %v564_v52, %v1646_v35 }
 0x167   : > { %v1474_v58 = vunpack.i.h.bf16 %v1472_v55  ;;  %v1473_v59 = vunpack.i.l.bf16 %v1472_v55  ;;  %v1469_v60 = vunpack.i.h.bf16 %v1467_v56  ;;  %v1468_v61 = vunpack.i.l.bf16 %v1467_v56 }
 0x168   : > { %1386 = vmatprep.subr.bf16.mxu0 %v1385_v57  ;;  %1403 = vmatpush3.bf16.msra.mxu1 %v1402_v53 }
 0x169   : > { %1388 = vmatpush1.bf16.msra.mxu0 %v1387_v54  ;;  %v582_v62 = vsel %vm580_vm4, %v1468_v61, %v1469_v60  ;;  %v600_v63 = vsel %vm598_vm3, %v1473_v59, %v1474_v58  ;;  %1404 = vmatprep.subr.bf16.mxu1 %v1536_v28 }
 0x16a   : > { %v1482_v0 = vpop.permute.xlu0 %1481  ;;  %v1477_v2 = vpop.permute.xlu1 %1476  ;;  %v1389_v3 = vpack.c.bf16 %v600_v63, %v582_v62 }
 0x16b   : > { %v1484_v4 = vunpack.i.h.bf16 %v1482_v0  ;;  %v1483_v5 = vunpack.i.l.bf16 %v1482_v0  ;;  %v1479_v6 = vunpack.i.h.bf16 %v1477_v2  ;;  %v1478_v7 = vunpack.i.l.bf16 %v1477_v2 }
 0x16c   : > { %1390 = vmatprep.subr.bf16.mxu0 %v1389_v3 }
 0x16d   : > { %v601_v8 = vsel %vm598_vm3, %v1474_v58, %v1484_v4  ;;  %v599_v9 = vsel %vm598_vm3, %v1483_v5, %v1473_v59  ;;  %v581_v10 = vsel %vm580_vm4, %v1478_v7, %v1468_v61  ;;  %v583_v11 = vsel %vm580_vm4, %v1469_v60, %v1479_v6  ;;  %v698_v61 = vld [vmem:[%s1743_s4] sm:$0xff] }
 0x16e   : > { %v1391_v12 = vpack.c.bf16 %v599_v9, %v581_v10  ;;  %v1405_v13 = vpack.c.bf16 %v601_v8, %v583_v11  ;;  %v1492_v14 = vpop.permute.xlu0 %1491  ;;  %v1487_v15 = vpop.permute.xlu1 %1486 }
 0x16f   : > { %v1494_v16 = vunpack.i.h.bf16 %v1492_v14  ;;  %v1493_v17 = vunpack.i.l.bf16 %v1492_v14  ;;  %v1489_v18 = vunpack.i.h.bf16 %v1487_v15  ;;  %v1488_v19 = vunpack.i.l.bf16 %v1487_v15  ;;  %v881_v14 = vld [vmem:[%s1745_s6 + $0x8] sm:$0xff] }
 0x170   : > { %1392 = vmatpush1.bf16.msra.mxu0 %v1391_v12  ;;  %1406 = vmatpush3.bf16.msra.mxu1 %v1405_v13  ;;  %v880_v13 = vld [vmem:[%s1745_s6] sm:$0xff] }
 0x171   : > { %v618_v20 = vsel %vm616_vm6, %v1488_v19, %v1489_v18  ;;  %v636_v21 = vsel %vm634_vm5, %v1493_v17, %v1494_v16  ;;  %1407 = vmatprep.subr.bf16.mxu1 %v1536_v28 }
 0x172   : > { %v1502_v22 = vpop.permute.xlu0 %1501  ;;  %v1497_v23 = vpop.permute.xlu1 %1496  ;;  %v1393_v24 = vpack.c.bf16 %v636_v21, %v618_v20  ;;  %v1052_v21 = vld [vmem:[%s1747_s8] sm:$0xff] }
 0x173   : > { %v1504_v25 = vunpack.i.h.bf16 %v1502_v22  ;;  %v1503_v26 = vunpack.i.l.bf16 %v1502_v22  ;;  %v1499_v27 = vunpack.i.h.bf16 %v1497_v23  ;;  %v1498_v29 = vunpack.i.l.bf16 %v1497_v23  ;;  %v1053_v22 = vld [vmem:[%s1747_s8 + $0x8] sm:$0xff] }
 0x174   : > { %1394 = vmatprep.subr.bf16.mxu0 %v1393_v24 }
 0x175   : > { %v635_v30 = vsel %vm634_vm5, %v1503_v26, %v1493_v17  ;;  %v637_v31 = vsel %vm634_vm5, %v1494_v16, %v1504_v25  ;;  %v617_v32 = vsel %vm616_vm6, %v1498_v29, %v1488_v19  ;;  %v619_v33 = vsel %vm616_vm6, %v1489_v18, %v1499_v27 }
 0x176   : > { %v1395_v34 = vpack.c.bf16 %v635_v30, %v617_v32  ;;  %v1408_v35 = vpack.c.bf16 %v637_v31, %v619_v33  ;;  %v1512_v36 = vpop.permute.xlu0 %1511  ;;  %v1507_v37 = vpop.permute.xlu1 %1506 }
 0x177   : > { %v1514_v38 = vunpack.i.h.bf16 %v1512_v36  ;;  %v1513_v39 = vunpack.i.l.bf16 %v1512_v36  ;;  %v1509_v40 = vunpack.i.h.bf16 %v1507_v37  ;;  %v1508_v41 = vunpack.i.l.bf16 %v1507_v37 }
 0x178   : > { %1396 = vmatpush1.bf16.msra.mxu0 %v1395_v34  ;;  %1409 = vmatpush3.bf16.msra.mxu1 %v1408_v35 }
 0x179   : > { %v654_v42 = vsel %vm652_vm8, %v1508_v41, %v1509_v40  ;;  %v672_v43 = vsel %vm670_vm7, %v1513_v39, %v1514_v38  ;;  %1410 = vmatprep.subr.bf16.mxu1 %v1536_v28 }
 0x17a   : > { %v1522_v44 = vpop.permute.xlu0 %1521  ;;  %v1517_v45 = vpop.permute.xlu1 %1516  ;;  %v1397_v46 = vpack.c.bf16 %v672_v43, %v654_v42 }
 0x17b   : > { %v1524_v47 = vunpack.i.h.bf16 %v1522_v44  ;;  %v1523_v48 = vunpack.i.l.bf16 %v1522_v44  ;;  %v1519_v49 = vunpack.i.h.bf16 %v1517_v45  ;;  %v1518_v50 = vunpack.i.l.bf16 %v1517_v45 }
 0x17c   : > { %1398 = vmatprep.subr.bf16.mxu0 %v1397_v46 }
 0x17d   : > { %v671_v51 = vsel %vm670_vm7, %v1523_v48, %v1513_v39  ;;  %v673_v52 = vsel %vm670_vm7, %v1514_v38, %v1524_v47  ;;  %v653_v53 = vsel %vm652_vm8, %v1518_v50, %v1508_v41  ;;  %v655_v54 = vsel %vm652_vm8, %v1509_v40, %v1519_v49 }
 0x17e   : > { %v1399_v55 = vpack.c.bf16 %v671_v51, %v653_v53  ;;  %v1411_v56 = vpack.c.bf16 %v673_v52, %v655_v54  ;;  %v685_v28 = vpop.permute.xlu0 %684  ;;  %v683_v57 = vpop.permute.xlu1 %682 }
 0x17f   : > { %v690_v58 = vsel %vm688_vm9, %v683_v57, %v685_v28 }
 0x180   : > { %1400 = vmatpush1.bf16.msra.mxu0 %v1399_v55  ;;  %1412 = vmatpush3.bf16.msra.mxu1 %v1411_v56 }
 0x181   : > { %752 = vmatprep.subr.mxu0 %v690_v58  ;;  %1370 = vmatprep.subr.mxu1 %v1534_v1 }
 0x182   : > { %v687_v59 = vpop.permute.xlu0 %686  ;;  %v681_v60 = vpop.permute.xlu1 %680 }
 0x183   : > { %v691_v62 = vsel %vm688_vm9, %v685_v28, %v687_v59  ;;  %v689_v63 = vsel %vm688_vm9, %v681_v60, %v683_v57 }
 0x184   : > { %753 = vmatpush1.msra.mxu0 %v689_v63  ;;  %1371 = vmatpush3.msra.mxu1 %v691_v62 }
 0x185   : > { %1325 = vmatmul.mubr.msk.f32.vlgmr.msra.gmra.mrb[2].mxu0 %vm732_vm10, %v698_v61  ;;  %1373 = vmatmul.mubr.msk.f32.vlgmr.msra.gmra.mrb[2].mxu1 %vm732_vm10, %v698_v61 }
 0x186   : > { %964 = vmatprep.mubr.f32.mxu0 %v1534_v1  ;;  %970 = vmatprep.mubr.f32.mxu1 %v1534_v1  ;;  %v1073_v2 = vpop.permute.xlu0 %1072 }
 0x18a   : > { %v1071_v15 = vpop.permute.xlu0 %1070 }
 0x18b   : > { %v1078_v17 = vsel %vm616_vm6, %v1071_v15, %v1073_v2 }
 0x193   : > { %v730_v0 = vpop.permute.xlu1 %729 }
 0x197   : > { %v1075_v3 = vpop.permute.xlu1 %1074 }
 0x198   : > { %v1079_v16 = vsel %vm616_vm6, %v1073_v2, %v1075_v3 }
 0x19b   : > { %v1077_v18 = vpop.permute.xlu1 %1076  ;;  %v892_v23 = vpop.permute.xlu0 %891 }
 0x19c   : > { %v1080_v20 = vsel %vm616_vm6, %v1075_v3, %v1077_v18 }
 0x19f   : > { %v887_v26 = vpop.permute.xlu1 %886  ;;  %v1059_v27 = vpop.permute.xlu0 %1058 }
 0x1a0   : > { %v1415_v29 = vadd.f32 %v1059_v27, %v887_v26 }
 0x1a3   : > { %v1064_v31 = vpop.permute.xlu1 %1063 }
 0x1a4   : > { %v1425_v36 = vadd.f32 %v1064_v31, %v892_v23 }
 0x258   : > { %v802_v4 = vpop.f32.mrb[2].mxu0  ;;  %v873_v5 = vpop.f32.mrb[2].mxu1 }
 0x259   : > { %v803_v6 = vadd.f32 %v802_v4, %v730_v0  ;;  %v804_v7 = vpop.f32.mrb[3].mxu0  ;;  %v1374_v8 = vpop.f32.mrb[3].mxu1  ;;  %v874_v10 = vadd.f32 %v873_v5, %v730_v0 }
 0x25a   : > { %v805_v9 = vadd.f32 %v804_v7, %v730_v0 }
 0x25b   : > { %v877_v12 = vmax.f32 %v803_v6, 0.0  ;;  %v879_v19 = vmax.f32 %v874_v10, 0.0 }
 0x25c   : > { %v878_v11 = vmax.f32 %v805_v9, 0.0 }
 0x25e   : > { %900 = vmatprep.subr.mxu0 %v878_v11  ;;  %1413 = vmatprep.subr.mxu1 %v878_v11 }
 0x25f   : > { %901 = vmatpush1.msra.mxu0 %v877_v12  ;;  %1414 = vmatpush1.msra.mxu1 %v877_v12 }
 0x260   : > { %1327 = vmatmul.mubr.msk.f32.vlgmr.msra.gmra.mrb[4].mxu0 %vm371_vm0, %v880_v13  ;;  %1328 = vmatmul.mubr.msk.f32.vlgmr.msra.gmra.mrb[4].mxu1 %vm371_vm0, %v881_v14 }
 0x261   : > { %1375 = vmatprep.subr.mxu1 %v879_v19  ;;  %1090 = vmatprep.subr.mxu0 %v1079_v16 }
 0x262   : > { %1376 = vmatpush3.msra.mxu1 %v879_v19  ;;  %1091 = vmatpush1.msra.mxu0 %v1078_v17 }
 0x263   : > { %1380 = vmatprep.subr.mxu1 %v1080_v20  ;;  %1377 = vmatprep.mubr.msk.f32.mxu1 %vm371_vm0, %v880_v13 }
 0x264   : > { %1378 = vmatmul.mubr.msk.f32.vlgmr.msra.gmra.mrb[6].mxu1 %vm371_vm0, %v881_v14  ;;  %1154 = vmatprep.mubr.f32.mxu0 %v1534_v1 }
 0x265   : > { %1381 = vmatpush3.msra.mxu1 %v1080_v20  ;;  %1382 = vmatprep.mubr.msk.f32.mxu1 %vm371_vm0, %v1052_v21 }
 0x268   : > { %1331 = vmatmul.mubr.msk.f32.vlgmr.msra.gmra.mrb[4].mxu0 %vm371_vm0, %v1052_v21 }
 0x269   : > { %1160 = vmatprep.mubr.f32.mxu0 %v1534_v1 }
 0x26c   : > { %1332 = vmatmul.mubr.msk.f32.gmra.mrb[6].mxu0 %vm371_vm0, %v1053_v22  ;;  %1383 = vmatmul.mubr.msk.f32.vlgmr.msra.gmra.mrb[6].mxu1 %vm371_vm0, %v1053_v22 }
 0x333   : > { %v972_v24 = vpop.f32.mrb[4].mxu1 }
 0x334   : > { %v974_v25 = vpop.f32.mrb[5].mxu1  ;;  %v973_v30 = vadd.f32 %v972_v24, %v892_v23 }
 0x335   : > { %v975_v32 = vadd.f32 %v974_v25, %v892_v23 }
 0x336   : > { %v1420_v38 = vadd.f32 %v1064_v31, %v973_v30 }
 0x337   : > { %v1423_v42 = vadd.f32 %v1064_v31, %v975_v32 }
 0x33b   : > { %v1156_v33 = vpop.f32.mrb[4].mxu0 }
 0x33c   : > { %v1416_v1 = vadd.f32 %v1415_v29, %v1156_v33  ;;  %v1158_v34 = vpop.f32.mrb[5].mxu0 }
 0x33d   : > { %v1418_v35 = vadd.f32 %v1415_v29, %v1158_v34 }
 0x33e   : > { %v1248_v37 = vmax.f32 %v1416_v1, 0.0 }
 0x33f   : > { %v1249_v39 = vmax.f32 %v1418_v35, 0.0  ;;  %v1162_v40 = vpop.f32.mrb[6].mxu0  ;;  %v1384_v41 = vpop.f32.mrb[6].mxu1 }
 0x340   : > { %1254 = vst [vmem:[%s359_s20] sm:$0xff] %v1248_v37  ;;  %v1421_v43 = vadd.f32 %v1420_v38, %v1162_v40  ;;  %v1426_v44 = vadd.f32 %v1425_v36, %v1384_v41  ;;  %v1164_v45 = vpop.f32.mrb[7].mxu0  ;;  %v1233_v46 = vpop.f32.mrb[7].mxu1 }
 0x341   : > { %1255 = vst [vmem:[%s359_s20 + $0x8] sm:$0xff] %v1249_v39  ;;  %v1424_v47 = vadd.f32 %v1423_v42, %v1164_v45  ;;  %v1428_v48 = vadd.f32 %v1415_v29, %v1233_v46 }
 0x342   : > { %v1251_v49 = vmax.f32 %v1421_v43, 0.0  ;;  %v1253_v50 = vmax.f32 %v1426_v44, 0.0 }
 0x343   : > { %v1252_v51 = vmax.f32 %v1424_v47, 0.0  ;;  %v1250_v52 = vmax.f32 %v1428_v48, 0.0 }
 0x344   : > { %1257 = vst [vmem:[%s359_s20 + $0x18] sm:$0xff] %v1251_v49  ;;  %1259 = vst [vmem:[%s359_s20 + $0x28] sm:$0xff] %v1253_v50 }
 0x345   : > { %1258 = vst [vmem:[%s359_s20 + $0x20] sm:$0xff] %v1252_v51  ;;  %1256 = vst [vmem:[%s359_s20 + $0x10] sm:$0xff] %v1250_v52 }
 0x346 PF: > { %s20_s13 = sadd.s32 1, %s1532_s13  }
 0x347   : > { %p17_p4 = scmp.ge.s32.totalorder %s20_s13, 4  }
 0x349   :  { %19 = sbr.rel (!%p17_p4) target bundleno = 1 (0x1), region = 90 }

</bundles_post_ra>
